<compile_context>
chip_gen: v5e
topology: v5e:2x2
jax: 0.10.0
libtpu: 0.0.40
codegen_flags: <defaults>
</compile_context>

<pallas_src>
import functools

import numpy as np
import jax
import jax.numpy as jnp
from jax import lax
from jax.experimental import pallas as pl
from jax.experimental.pallas import tpu as pltpu


# ----------------------------------------------------------------------------
# Host-side (numpy, float64) construction of the fixed transform matrices
# ----------------------------------------------------------------------------
def _j0(x):
    x = np.asarray(x, dtype=np.float64)
    ax = np.abs(x)
    y = (x / 3.0) ** 2
    small = (1.0 - 2.2499997 * y + 1.2656208 * y**2 - 0.3163866 * y**3
             + 0.0444479 * y**4 - 0.0039444 * y**5 + 0.00021 * y**6)
    axs = np.where(ax > 0, ax, 1.0)
    z = 3.0 / axs
    f0 = (0.79788456 - 0.00000077 * z - 0.00552740 * z**2 - 0.00009512 * z**3
          + 0.00137237 * z**4 - 0.00072805 * z**5 + 0.00014476 * z**6)
    th = (ax - 0.78539816 - 0.04166397 * z - 0.00003954 * z**2 + 0.00262573 * z**3
          - 0.00054125 * z**4 - 0.00029333 * z**5 + 0.00013558 * z**6)
    large = f0 * np.cos(th) / np.sqrt(axs)
    return np.where(ax <= 3.0, small, large)


def _j1(x):
    x = np.asarray(x, dtype=np.float64)
    ax = np.abs(x)
    y = (x / 3.0) ** 2
    small = x * (0.5 - 0.56249985 * y + 0.21093573 * y**2 - 0.03954289 * y**3
                 + 0.00443319 * y**4 - 0.00031761 * y**5 + 0.00001109 * y**6)
    axs = np.where(ax > 0, ax, 1.0)
    z = 3.0 / axs
    f1 = (0.79788456 + 0.00000156 * z + 0.01659667 * z**2 + 0.00017105 * z**3
          - 0.00249511 * z**4 + 0.00113653 * z**5 - 0.00020033 * z**6)
    th = (ax - 2.35619449 + 0.12499612 * z + 0.00005650 * z**2 - 0.00637879 * z**3
          + 0.00074348 * z**4 + 0.00079824 * z**5 - 0.00029166 * z**6)
    large = f1 * np.cos(th) / np.sqrt(axs)
    large = np.where(x < 0, -large, large)
    return np.where(ax <= 3.0, small, large)


def _j0_zeros(n):
    """First n zeros of J0 via McMahon expansion + Newton (J0' = -J1)."""
    k = np.arange(1, n + 1, dtype=np.float64)
    beta = (k - 0.25) * np.pi
    x = beta + 1.0 / (8.0 * beta) - 124.0 / (3.0 * (8.0 * beta) ** 3)
    for _ in range(20):
        x = x + _j0(x) / _j1(x)
    return x


def make_qdht_matrices(n_alpha, R):
    """Quasi-discrete Hankel transform (order 0).  Returns (r_pts, T_fwd, T_inv) in f64."""
    j = _j0_zeros(n_alpha + 1)
    S = j[n_alpha]               # j_{N+1}
    jn = j[:n_alpha]
    r = jn * R / S               # radial sample points (HT.r)
    V = S / (2.0 * np.pi * R)
    J1 = np.abs(_j1(jn))
    C = 2.0 * _j0(np.outer(jn, jn) / S) / (S * np.outer(J1, J1))
    jr = J1 / R
    jv = J1 / V
    T_fwd = np.diag(jv) @ C @ np.diag(1.0 / jr)
    T_inv = np.diag(jr) @ C @ np.diag(1.0 / jv)
    return r, T_fwd, T_inv


def linear_interp_matrix(r_new, r_old):
    """M @ f_old == f interpolated from r_old grid onto r_new points (clamped), f64."""
    r_new = np.asarray(r_new, dtype=np.float64)
    r_old = np.asarray(r_old, dtype=np.float64)
    n_new, n_old = len(r_new), len(r_old)
    M = np.zeros((n_new, n_old), dtype=np.float64)
    idx = np.clip(np.searchsorted(r_old, r_new) - 1, 0, n_old - 2)
    x0, x1 = r_old[idx], r_old[idx + 1]
    w = np.clip((r_new - x0) / (x1 - x0), 0.0, 1.0)
    M[np.arange(n_new), idx] = 1.0 - w
    M[np.arange(n_new), idx + 1] = w
    return M


def make_truncated_dft_matrices(nz, m2):
    """Forward (nz,m2)x2 and inverse (m2,nz)x2 real DFT matrices matching
    rfft-truncate-to-m2 / zero-pad-irfft(n=nz) semantics (imag of DC/Nyquist
    bins naturally contributes nothing since sin rows are identically zero)."""
    k = np.arange(m2, dtype=np.float64)
    z = np.arange(nz, dtype=np.float64)
    ang_f = 2.0 * np.pi * np.outer(z, k) / nz        # (nz, m2)
    Fr = np.cos(ang_f)
    Fi = -np.sin(ang_f)
    ck = np.full(m2, 2.0)
    ck[0] = 1.0
    if nz % 2 == 0 and m2 - 1 >= nz // 2:
        ck[nz // 2] = 1.0                            # Nyquist bin is not doubled
    ang_i = 2.0 * np.pi * np.outer(k, z) / nz        # (m2, nz)
    Gr = (ck[:, None] * np.cos(ang_i)) / nz
    Gi = -(ck[:, None] * np.sin(ang_i)) / nz
    return Fr, Fi, Gr, Gi


# ----------------------------------------------------------------------------
# Fused Pallas kernel: one grid step == one batch element, everything in VMEM.
# ----------------------------------------------------------------------------
def _fused_spectral_kernel(x_ref, afwd_ref, fr_ref, fi_ref, wr_ref, wi_ref,
                           gr_ref, gi_ref, abwd_ref, o_ref, *, compute_dtype):
    f32 = jnp.float32
    cd = compute_dtype

    x = x_ref[0]                          # (Ci, nr, nz)
    A = afwd_ref[...].astype(cd)          # (m1, nr)   pre-composed (Tf @ Mf)[:m1]
    Fr = fr_ref[...].astype(cd)           # (nz, m2)   truncated rfft (real part)
    Fi = fi_ref[...].astype(cd)           # (nz, m2)   truncated rfft (imag part)
    Gr = gr_ref[...].astype(cd)           # (m2, nz)   truncated irfft (real part)
    Gi = gi_ref[...].astype(cd)           # (m2, nz)   truncated irfft (imag part)
    Bw = abwd_ref[...].astype(cd)         # (nr, m1)   pre-composed (Mb @ Ti)[:, :m1]
    Wr = wr_ref[...]                      # (Ci, Co, m1, m2)  spectral weights (real)
    Wi = wi_ref[...]                      # (Ci, Co, m1, m2)  spectral weights (imag)

    Ci = x.shape[0]
    Co = Wr.shape[1]
    m1, m2 = Wr.shape[2], Wr.shape[3]

    # Accumulators for the mixed spectral modes (kept in f32 on the VPU).
    or_acc = [jnp.zeros((m1, m2), f32) for _ in range(Co)]
    oi_acc = [jnp.zeros((m1, m2), f32) for _ in range(Co)]

    # ---- forward: radial transform + truncated DFT + complex channel mix ----
    for c in range(Ci):                                           # static unroll
        xc = x[c].astype(cd)                                      # (nr, nz)
        y1 = jnp.dot(A, xc, preferred_element_type=f32)           # (m1, nz)
        y1c = y1.astype(cd)
        xr = jnp.dot(y1c, Fr, preferred_element_type=f32)         # (m1, m2) Re
        xi = jnp.dot(y1c, Fi, preferred_element_type=f32)         # (m1, m2) Im
        for o in range(Co):                                       # static unroll
            wr_co = Wr[c, o]                                      # (m1, m2)
            wi_co = Wi[c, o]
            or_acc[o] = or_acc[o] + xr * wr_co - xi * wi_co
            oi_acc[o] = oi_acc[o] + xr * wi_co + xi * wr_co

    # ---- backward: truncated inverse DFT + inverse radial transform ----
    for o in range(Co):                                           # static unroll
        zline = (jnp.dot(or_acc[o].astype(cd), Gr, preferred_element_type=f32)
                 + jnp.dot(oi_acc[o].astype(cd), Gi, preferred_element_type=f32))
        out_o = jnp.dot(Bw, zline.astype(cd), preferred_element_type=f32)  # (nr, nz)
        o_ref[0, o, :, :] = out_o.astype(o_ref.dtype)


# ----------------------------------------------------------------------------
# Module equivalent
# ----------------------------------------------------------------------------
class CylindricallySymmetricSpectralConv2dPallas:
    def __init__(self, in_channels, out_channels, modes1, modes2,
                 nr, nz, lr, lz, R, n_alpha, key, compute_dtype=jnp.float32):
        # NOTE: the PyTorch forward implicitly requires n_alpha == nr (out_ft is
        # allocated with r-dim = nr and then fed to HT.inverse).
        assert n_alpha == nr, "module semantics require n_alpha == nr"
        assert modes1 <= n_alpha and modes2 <= nz // 2 + 1

        self.in_channels = in_channels
        self.out_channels = out_channels
        self.modes1 = modes1
        self.modes2 = modes2
        self.nr = nr
        self.nz = nz
        # Matmul operand dtype.  jnp.bfloat16 is recommended on v6e/v7x at
        # production sizes (f32 accumulation is always used); f32 kept here.
        self.compute_dtype = compute_dtype

        scale = 1.0 / (in_channels * out_channels)
        k1, k2 = jax.random.split(key)
        wshape = (in_channels, out_channels, modes1, modes2)
        self.wr = (scale * jax.random.uniform(k1, wshape)).astype(jnp.float32)
        self.wi = (scale * jax.random.uniform(k2, wshape)).astype(jnp.float32)

        # Fixed transform matrices (built in float64 on the host).
        dr = lr / nr
        r = np.arange(dr / 2.0, lr, dr)
        ht_r, T_fwd, T_inv = make_qdht_matrices(n_alpha, R)
        Mf = linear_interp_matrix(ht_r, r)        # (n_alpha, nr)
        Mb = linear_interp_matrix(r, ht_r)        # (nr, n_alpha)

        # Pre-composed + modes1-truncated radial operators.
        A_fwd = (T_fwd @ Mf)[:modes1, :]          # (m1, nr)
        A_bwd = (Mb @ T_inv)[:, :modes1]          # (nr, m1)
        Fr, Fi, Gr, Gi = make_truncated_dft_matrices(nz, modes2)

        f32 = jnp.float32
        self.A_fwd = jnp.asarray(A_fwd, f32)
        self.A_bwd = jnp.asarray(A_bwd, f32)
        self.Fr = jnp.asarray(Fr, f32)
        self.Fi = jnp.asarray(Fi, f32)
        self.Gr = jnp.asarray(Gr, f32)
        self.Gi = jnp.asarray(Gi, f32)

        # Un-composed matrices kept only for the pure-JAX reference.
        self.Mf = jnp.asarray(Mf, f32)
        self.Mb = jnp.asarray(Mb, f32)
        self.Tf = jnp.asarray(T_fwd, f32)
        self.Ti = jnp.asarray(T_inv, f32)

    def __call__(self, x):
        assert x.ndim == 4
        B, Ci, nr, nz = x.shape
        assert Ci == self.in_channels and nr == self.nr and nz == self.nz
        x = x.astype(jnp.float32)
        Co, m1, m2 = self.out_channels, self.modes1, self.modes2

        kernel = functools.partial(_fused_spectral_kernel,
                                   compute_dtype=self.compute_dtype)
        call = pl.pallas_call(
            kernel,
            out_shape=jax.ShapeDtypeStruct((B, Co, nr, nz), jnp.float32),
            grid=(B,),
            in_specs=[
                pl.BlockSpec((1, Ci, nr, nz), lambda b: (b, 0, 0, 0)),   # x
                pl.BlockSpec((m1, nr), lambda b: (0, 0)),                # A_fwd
                pl.BlockSpec((nz, m2), lambda b: (0, 0)),                # Fr
                pl.BlockSpec((nz, m2), lambda b: (0, 0)),                # Fi
                pl.BlockSpec((Ci, Co, m1, m2), lambda b: (0, 0, 0, 0)),  # wr
                pl.BlockSpec((Ci, Co, m1, m2), lambda b: (0, 0, 0, 0)),  # wi
                pl.BlockSpec((m2, nz), lambda b: (0, 0)),                # Gr
                pl.BlockSpec((m2, nz), lambda b: (0, 0)),                # Gi
                pl.BlockSpec((nr, m1), lambda b: (0, 0)),                # A_bwd
            ],
            out_specs=pl.BlockSpec((1, Co, nr, nz), lambda b: (b, 0, 0, 0)),
            compiler_params=pltpu.CompilerParams(
                dimension_semantics=("parallel",),      # >=2 steps -> both v7x TCs busy
                vmem_limit_bytes=32 * 1024 * 1024,
            ),
        )
        return call(x, self.A_fwd, self.Fr, self.Fi, self.wr, self.wi,
                    self.Gr, self.Gi, self.A_bwd)

    # Pure-JAX reference following the original (un-fused) formulation.
    def reference(self, x):
        B, C, nr, nz = x.shape
        m1, m2, Co = self.modes1, self.modes2, self.out_channels
        prec = lax.Precision.HIGHEST
        x_i = jnp.einsum('pr,bcrz->bcpz', self.Mf, x, precision=prec)
        x_ht = jnp.einsum('pr,bcrz->bcpz', self.Tf, x_i, precision=prec)
        x_ft = jnp.fft.rfft(x_ht, axis=-1)
        w = (self.wr + 1j * self.wi).astype(jnp.complex64)
        out = jnp.einsum('birz,iorz->borz', x_ft[:, :, :m1, :m2], w,
                         precision=prec)
        out_ft = jnp.zeros((B, Co, nr, nz // 2 + 1), dtype=jnp.complex64)
        out_ft = out_ft.at[:, :, :m1, :m2].set(out)
        x_o = jnp.fft.irfft(out_ft, n=nz, axis=-1)
        x_o = jnp.einsum('pr,bcrz->bcpz', self.Ti, x_o, precision=prec)
        x_o = jnp.einsum('pr,bcrz->bcpz', self.Mb, x_o, precision=prec)
        return x_o


if __name__ == "__main__":
    batch, in_channels, out_channels = 2, 4, 3
    nr = nz = 16
    n_alpha = nr
    modes1, modes2 = 6, 5
    lr = lz = R = 1.0

    key = jax.random.PRNGKey(0)
    k_w, k_x = jax.random.split(key)

    layer = CylindricallySymmetricSpectralConv2dPallas(
        in_channels, out_channels, modes1, modes2,
        nr, nz, lr, lz, R, n_alpha, key=k_w)

    x = jax.random.normal(k_x, (batch, in_channels, nr, nz), dtype=jnp.float32)

    out = jax.block_until_ready(layer(x))
    ref = jax.block_until_ready(layer.reference(x))

    err = float(jnp.max(jnp.abs(out - ref)) / (jnp.max(jnp.abs(ref)) + 1e-8))
    assert out.shape == (batch, out_channels, nr, nz), out.shape
    # 5e-3 tolerance covers MXU pass-precision differences between the Pallas
    # dots and the XLA reference einsums/FFT; an algorithmic error would be >>1e-2.
    assert err < 5e-3, f"relative error too large: {err}"

    print("KERNEL_OK")
</pallas_src>

<mosaic_0001>
module attributes {stable_mosaic.version = 11 : i64} {
  func.func @_fused_spectral_kernel(%arg0: i32, %arg1: memref<1x4x16x16xf32, #tpu.memory_space<vmem>>, %arg2: memref<6x16xf32, #tpu.memory_space<vmem>>, %arg3: memref<16x5xf32, #tpu.memory_space<vmem>>, %arg4: memref<16x5xf32, #tpu.memory_space<vmem>>, %arg5: memref<4x3x6x5xf32, #tpu.memory_space<vmem>>, %arg6: memref<4x3x6x5xf32, #tpu.memory_space<vmem>>, %arg7: memref<5x16xf32, #tpu.memory_space<vmem>>, %arg8: memref<5x16xf32, #tpu.memory_space<vmem>>, %arg9: memref<16x6xf32, #tpu.memory_space<vmem>>, %arg10: memref<1x3x16x16xf32, #tpu.memory_space<vmem>>) attributes {dimension_semantics = [#tpu.dimension_semantics<parallel>], iteration_bounds = array<i64: 2>, scalar_prefetch = 0 : i64, scratch_operands = 0 : i64, tpu.core_type = #tpu.core_type<tc>, window_params = [{transform_indices = @transform_0, window_bounds = array<i64: 1, 4, 16, 16>}, {pipeline_mode = #tpu.pipeline_mode<synchronous>, transform_indices = @transform_1, window_bounds = array<i64: 6, 16>}, {pipeline_mode = #tpu.pipeline_mode<synchronous>, transform_indices = @transform_2, window_bounds = array<i64: 16, 5>}, {pipeline_mode = #tpu.pipeline_mode<synchronous>, transform_indices = @transform_3, window_bounds = array<i64: 16, 5>}, {pipeline_mode = #tpu.pipeline_mode<synchronous>, transform_indices = @transform_4, window_bounds = array<i64: 4, 3, 6, 5>}, {pipeline_mode = #tpu.pipeline_mode<synchronous>, transform_indices = @transform_5, window_bounds = array<i64: 4, 3, 6, 5>}, {pipeline_mode = #tpu.pipeline_mode<synchronous>, transform_indices = @transform_6, window_bounds = array<i64: 5, 16>}, {pipeline_mode = #tpu.pipeline_mode<synchronous>, transform_indices = @transform_7, window_bounds = array<i64: 5, 16>}, {pipeline_mode = #tpu.pipeline_mode<synchronous>, transform_indices = @transform_8, window_bounds = array<i64: 16, 6>}, {transform_indices = @transform_9, window_bounds = array<i64: 1, 3, 16, 16>}]} {
    %c0 = arith.constant 0 : index
    %c0_0 = arith.constant 0 : index
    %c0_1 = arith.constant 0 : index
    %c0_2 = arith.constant 0 : index
    %0 = vector.load %arg1[%c0, %c0_0, %c0_1, %c0_2] : memref<1x4x16x16xf32, #tpu.memory_space<vmem>>, vector<1x4x16x16xf32>
    %1 = vector.shape_cast %0 : vector<1x4x16x16xf32> to vector<4x16x16xf32>
    %c0_3 = arith.constant 0 : index
    %c0_4 = arith.constant 0 : index
    %2 = vector.load %arg2[%c0_3, %c0_4] : memref<6x16xf32, #tpu.memory_space<vmem>>, vector<6x16xf32>
    %c0_5 = arith.constant 0 : index
    %c0_6 = arith.constant 0 : index
    %3 = vector.load %arg3[%c0_5, %c0_6] : memref<16x5xf32, #tpu.memory_space<vmem>>, vector<16x5xf32>
    %c0_7 = arith.constant 0 : index
    %c0_8 = arith.constant 0 : index
    %4 = vector.load %arg4[%c0_7, %c0_8] : memref<16x5xf32, #tpu.memory_space<vmem>>, vector<16x5xf32>
    %c0_9 = arith.constant 0 : index
    %c0_10 = arith.constant 0 : index
    %5 = vector.load %arg7[%c0_9, %c0_10] : memref<5x16xf32, #tpu.memory_space<vmem>>, vector<5x16xf32>
    %c0_11 = arith.constant 0 : index
    %c0_12 = arith.constant 0 : index
    %6 = vector.load %arg8[%c0_11, %c0_12] : memref<5x16xf32, #tpu.memory_space<vmem>>, vector<5x16xf32>
    %c0_13 = arith.constant 0 : index
    %c0_14 = arith.constant 0 : index
    %7 = vector.load %arg9[%c0_13, %c0_14] : memref<16x6xf32, #tpu.memory_space<vmem>>, vector<16x6xf32>
    %c0_15 = arith.constant 0 : index
    %c0_16 = arith.constant 0 : index
    %c0_17 = arith.constant 0 : index
    %c0_18 = arith.constant 0 : index
    %8 = vector.load %arg5[%c0_15, %c0_16, %c0_17, %c0_18] : memref<4x3x6x5xf32, #tpu.memory_space<vmem>>, vector<4x3x6x5xf32>
    %c0_19 = arith.constant 0 : index
    %c0_20 = arith.constant 0 : index
    %c0_21 = arith.constant 0 : index
    %c0_22 = arith.constant 0 : index
    %9 = vector.load %arg6[%c0_19, %c0_20, %c0_21, %c0_22] : memref<4x3x6x5xf32, #tpu.memory_space<vmem>>, vector<4x3x6x5xf32>
    %cst = arith.constant 0.000000e+00 : f32
    %10 = vector.broadcast %cst : f32 to vector<6x5xf32>
    %cst_23 = arith.constant 0.000000e+00 : f32
    %11 = vector.broadcast %cst_23 : f32 to vector<6x5xf32>
    %cst_24 = arith.constant 0.000000e+00 : f32
    %12 = vector.broadcast %cst_24 : f32 to vector<6x5xf32>
    %cst_25 = arith.constant 0.000000e+00 : f32
    %13 = vector.broadcast %cst_25 : f32 to vector<6x5xf32>
    %cst_26 = arith.constant 0.000000e+00 : f32
    %14 = vector.broadcast %cst_26 : f32 to vector<6x5xf32>
    %cst_27 = arith.constant 0.000000e+00 : f32
    %15 = vector.broadcast %cst_27 : f32 to vector<6x5xf32>
    %16 = vector.extract_strided_slice %1 {offsets = [0, 0, 0], sizes = [1, 16, 16], strides = [1, 1, 1]} : vector<4x16x16xf32> to vector<1x16x16xf32>
    %17 = vector.shape_cast %16 : vector<1x16x16xf32> to vector<16x16xf32>
    %cst_28 = arith.constant dense<0.000000e+00> : vector<6x16xf32>
    %18 = tpu.matmul %2, %17, %cst_28 {dimension_numbers = #tpu.dot_dimension_numbers<[1], [0], [0], [1], [0, 0, 1, 1], [], []>} : vector<6x16xf32>, vector<16x16xf32>, vector<6x16xf32> -> vector<6x16xf32>
    %cst_29 = arith.constant dense<0.000000e+00> : vector<6x5xf32>
    %19 = tpu.matmul %18, %3, %cst_29 {dimension_numbers = #tpu.dot_dimension_numbers<[1], [0], [0], [1], [0, 0, 1, 1], [], []>} : vector<6x16xf32>, vector<16x5xf32>, vector<6x5xf32> -> vector<6x5xf32>
    %cst_30 = arith.constant dense<0.000000e+00> : vector<6x5xf32>
    %20 = tpu.matmul %18, %4, %cst_30 {dimension_numbers = #tpu.dot_dimension_numbers<[1], [0], [0], [1], [0, 0, 1, 1], [], []>} : vector<6x16xf32>, vector<16x5xf32>, vector<6x5xf32> -> vector<6x5xf32>
    %21 = vector.extract_strided_slice %8 {offsets = [0, 0, 0, 0], sizes = [1, 1, 6, 5], strides = [1, 1, 1, 1]} : vector<4x3x6x5xf32> to vector<1x1x6x5xf32>
    %22 = vector.shape_cast %21 : vector<1x1x6x5xf32> to vector<6x5xf32>
    %23 = vector.extract_strided_slice %9 {offsets = [0, 0, 0, 0], sizes = [1, 1, 6, 5], strides = [1, 1, 1, 1]} : vector<4x3x6x5xf32> to vector<1x1x6x5xf32>
    %24 = vector.shape_cast %23 : vector<1x1x6x5xf32> to vector<6x5xf32>
    %25 = arith.mulf %19, %22 : vector<6x5xf32>
    %26 = arith.addf %10, %25 : vector<6x5xf32>
    %27 = arith.mulf %20, %24 : vector<6x5xf32>
    %28 = arith.subf %26, %27 : vector<6x5xf32>
    %29 = arith.mulf %19, %24 : vector<6x5xf32>
    %30 = arith.addf %13, %29 : vector<6x5xf32>
    %31 = arith.mulf %20, %22 : vector<6x5xf32>
    %32 = arith.addf %30, %31 : vector<6x5xf32>
    %33 = vector.extract_strided_slice %8 {offsets = [0, 1, 0, 0], sizes = [1, 1, 6, 5], strides = [1, 1, 1, 1]} : vector<4x3x6x5xf32> to vector<1x1x6x5xf32>
    %34 = vector.shape_cast %33 : vector<1x1x6x5xf32> to vector<6x5xf32>
    %35 = vector.extract_strided_slice %9 {offsets = [0, 1, 0, 0], sizes = [1, 1, 6, 5], strides = [1, 1, 1, 1]} : vector<4x3x6x5xf32> to vector<1x1x6x5xf32>
    %36 = vector.shape_cast %35 : vector<1x1x6x5xf32> to vector<6x5xf32>
    %37 = arith.mulf %19, %34 : vector<6x5xf32>
    %38 = arith.addf %11, %37 : vector<6x5xf32>
    %39 = arith.mulf %20, %36 : vector<6x5xf32>
    %40 = arith.subf %38, %39 : vector<6x5xf32>
    %41 = arith.mulf %19, %36 : vector<6x5xf32>
    %42 = arith.addf %14, %41 : vector<6x5xf32>
    %43 = arith.mulf %20, %34 : vector<6x5xf32>
    %44 = arith.addf %42, %43 : vector<6x5xf32>
    %45 = vector.extract_strided_slice %8 {offsets = [0, 2, 0, 0], sizes = [1, 1, 6, 5], strides = [1, 1, 1, 1]} : vector<4x3x6x5xf32> to vector<1x1x6x5xf32>
    %46 = vector.shape_cast %45 : vector<1x1x6x5xf32> to vector<6x5xf32>
    %47 = vector.extract_strided_slice %9 {offsets = [0, 2, 0, 0], sizes = [1, 1, 6, 5], strides = [1, 1, 1, 1]} : vector<4x3x6x5xf32> to vector<1x1x6x5xf32>
    %48 = vector.shape_cast %47 : vector<1x1x6x5xf32> to vector<6x5xf32>
    %49 = arith.mulf %19, %46 : vector<6x5xf32>
    %50 = arith.addf %12, %49 : vector<6x5xf32>
    %51 = arith.mulf %20, %48 : vector<6x5xf32>
    %52 = arith.subf %50, %51 : vector<6x5xf32>
    %53 = arith.mulf %19, %48 : vector<6x5xf32>
    %54 = arith.addf %15, %53 : vector<6x5xf32>
    %55 = arith.mulf %20, %46 : vector<6x5xf32>
    %56 = arith.addf %54, %55 : vector<6x5xf32>
    %57 = vector.extract_strided_slice %1 {offsets = [1, 0, 0], sizes = [1, 16, 16], strides = [1, 1, 1]} : vector<4x16x16xf32> to vector<1x16x16xf32>
    %58 = vector.shape_cast %57 : vector<1x16x16xf32> to vector<16x16xf32>
    %cst_31 = arith.constant dense<0.000000e+00> : vector<6x16xf32>
    %59 = tpu.matmul %2, %58, %cst_31 {dimension_numbers = #tpu.dot_dimension_numbers<[1], [0], [0], [1], [0, 0, 1, 1], [], []>} : vector<6x16xf32>, vector<16x16xf32>, vector<6x16xf32> -> vector<6x16xf32>
    %cst_32 = arith.constant dense<0.000000e+00> : vector<6x5xf32>
    %60 = tpu.matmul %59, %3, %cst_32 {dimension_numbers = #tpu.dot_dimension_numbers<[1], [0], [0], [1], [0, 0, 1, 1], [], []>} : vector<6x16xf32>, vector<16x5xf32>, vector<6x5xf32> -> vector<6x5xf32>
    %cst_33 = arith.constant dense<0.000000e+00> : vector<6x5xf32>
    %61 = tpu.matmul %59, %4, %cst_33 {dimension_numbers = #tpu.dot_dimension_numbers<[1], [0], [0], [1], [0, 0, 1, 1], [], []>} : vector<6x16xf32>, vector<16x5xf32>, vector<6x5xf32> -> vector<6x5xf32>
    %62 = vector.extract_strided_slice %8 {offsets = [1, 0, 0, 0], sizes = [1, 1, 6, 5], strides = [1, 1, 1, 1]} : vector<4x3x6x5xf32> to vector<1x1x6x5xf32>
    %63 = vector.shape_cast %62 : vector<1x1x6x5xf32> to vector<6x5xf32>
    %64 = vector.extract_strided_slice %9 {offsets = [1, 0, 0, 0], sizes = [1, 1, 6, 5], strides = [1, 1, 1, 1]} : vector<4x3x6x5xf32> to vector<1x1x6x5xf32>
    %65 = vector.shape_cast %64 : vector<1x1x6x5xf32> to vector<6x5xf32>
    %66 = arith.mulf %60, %63 : vector<6x5xf32>
    %67 = arith.addf %28, %66 : vector<6x5xf32>
    %68 = arith.mulf %61, %65 : vector<6x5xf32>
    %69 = arith.subf %67, %68 : vector<6x5xf32>
    %70 = arith.mulf %60, %65 : vector<6x5xf32>
    %71 = arith.addf %32, %70 : vector<6x5xf32>
    %72 = arith.mulf %61, %63 : vector<6x5xf32>
    %73 = arith.addf %71, %72 : vector<6x5xf32>
    %74 = vector.extract_strided_slice %8 {offsets = [1, 1, 0, 0], sizes = [1, 1, 6, 5], strides = [1, 1, 1, 1]} : vector<4x3x6x5xf32> to vector<1x1x6x5xf32>
    %75 = vector.shape_cast %74 : vector<1x1x6x5xf32> to vector<6x5xf32>
    %76 = vector.extract_strided_slice %9 {offsets = [1, 1, 0, 0], sizes = [1, 1, 6, 5], strides = [1, 1, 1, 1]} : vector<4x3x6x5xf32> to vector<1x1x6x5xf32>
    %77 = vector.shape_cast %76 : vector<1x1x6x5xf32> to vector<6x5xf32>
    %78 = arith.mulf %60, %75 : vector<6x5xf32>
    %79 = arith.addf %40, %78 : vector<6x5xf32>
    %80 = arith.mulf %61, %77 : vector<6x5xf32>
    %81 = arith.subf %79, %80 : vector<6x5xf32>
    %82 = arith.mulf %60, %77 : vector<6x5xf32>
    %83 = arith.addf %44, %82 : vector<6x5xf32>
    %84 = arith.mulf %61, %75 : vector<6x5xf32>
    %85 = arith.addf %83, %84 : vector<6x5xf32>
    %86 = vector.extract_strided_slice %8 {offsets = [1, 2, 0, 0], sizes = [1, 1, 6, 5], strides = [1, 1, 1, 1]} : vector<4x3x6x5xf32> to vector<1x1x6x5xf32>
    %87 = vector.shape_cast %86 : vector<1x1x6x5xf32> to vector<6x5xf32>
    %88 = vector.extract_strided_slice %9 {offsets = [1, 2, 0, 0], sizes = [1, 1, 6, 5], strides = [1, 1, 1, 1]} : vector<4x3x6x5xf32> to vector<1x1x6x5xf32>
    %89 = vector.shape_cast %88 : vector<1x1x6x5xf32> to vector<6x5xf32>
    %90 = arith.mulf %60, %87 : vector<6x5xf32>
    %91 = arith.addf %52, %90 : vector<6x5xf32>
    %92 = arith.mulf %61, %89 : vector<6x5xf32>
    %93 = arith.subf %91, %92 : vector<6x5xf32>
    %94 = arith.mulf %60, %89 : vector<6x5xf32>
    %95 = arith.addf %56, %94 : vector<6x5xf32>
    %96 = arith.mulf %61, %87 : vector<6x5xf32>
    %97 = arith.addf %95, %96 : vector<6x5xf32>
    %98 = vector.extract_strided_slice %1 {offsets = [2, 0, 0], sizes = [1, 16, 16], strides = [1, 1, 1]} : vector<4x16x16xf32> to vector<1x16x16xf32>
    %99 = vector.shape_cast %98 : vector<1x16x16xf32> to vector<16x16xf32>
    %cst_34 = arith.constant dense<0.000000e+00> : vector<6x16xf32>
    %100 = tpu.matmul %2, %99, %cst_34 {dimension_numbers = #tpu.dot_dimension_numbers<[1], [0], [0], [1], [0, 0, 1, 1], [], []>} : vector<6x16xf32>, vector<16x16xf32>, vector<6x16xf32> -> vector<6x16xf32>
    %cst_35 = arith.constant dense<0.000000e+00> : vector<6x5xf32>
    %101 = tpu.matmul %100, %3, %cst_35 {dimension_numbers = #tpu.dot_dimension_numbers<[1], [0], [0], [1], [0, 0, 1, 1], [], []>} : vector<6x16xf32>, vector<16x5xf32>, vector<6x5xf32> -> vector<6x5xf32>
    %cst_36 = arith.constant dense<0.000000e+00> : vector<6x5xf32>
    %102 = tpu.matmul %100, %4, %cst_36 {dimension_numbers = #tpu.dot_dimension_numbers<[1], [0], [0], [1], [0, 0, 1, 1], [], []>} : vector<6x16xf32>, vector<16x5xf32>, vector<6x5xf32> -> vector<6x5xf32>
    %103 = vector.extract_strided_slice %8 {offsets = [2, 0, 0, 0], sizes = [1, 1, 6, 5], strides = [1, 1, 1, 1]} : vector<4x3x6x5xf32> to vector<1x1x6x5xf32>
    %104 = vector.shape_cast %103 : vector<1x1x6x5xf32> to vector<6x5xf32>
    %105 = vector.extract_strided_slice %9 {offsets = [2, 0, 0, 0], sizes = [1, 1, 6, 5], strides = [1, 1, 1, 1]} : vector<4x3x6x5xf32> to vector<1x1x6x5xf32>
    %106 = vector.shape_cast %105 : vector<1x1x6x5xf32> to vector<6x5xf32>
    %107 = arith.mulf %101, %104 : vector<6x5xf32>
    %108 = arith.addf %69, %107 : vector<6x5xf32>
    %109 = arith.mulf %102, %106 : vector<6x5xf32>
    %110 = arith.subf %108, %109 : vector<6x5xf32>
    %111 = arith.mulf %101, %106 : vector<6x5xf32>
    %112 = arith.addf %73, %111 : vector<6x5xf32>
    %113 = arith.mulf %102, %104 : vector<6x5xf32>
    %114 = arith.addf %112, %113 : vector<6x5xf32>
    %115 = vector.extract_strided_slice %8 {offsets = [2, 1, 0, 0], sizes = [1, 1, 6, 5], strides = [1, 1, 1, 1]} : vector<4x3x6x5xf32> to vector<1x1x6x5xf32>
    %116 = vector.shape_cast %115 : vector<1x1x6x5xf32> to vector<6x5xf32>
    %117 = vector.extract_strided_slice %9 {offsets = [2, 1, 0, 0], sizes = [1, 1, 6, 5], strides = [1, 1, 1, 1]} : vector<4x3x6x5xf32> to vector<1x1x6x5xf32>
    %118 = vector.shape_cast %117 : vector<1x1x6x5xf32> to vector<6x5xf32>
    %119 = arith.mulf %101, %116 : vector<6x5xf32>
    %120 = arith.addf %81, %119 : vector<6x5xf32>
    %121 = arith.mulf %102, %118 : vector<6x5xf32>
    %122 = arith.subf %120, %121 : vector<6x5xf32>
    %123 = arith.mulf %101, %118 : vector<6x5xf32>
    %124 = arith.addf %85, %123 : vector<6x5xf32>
    %125 = arith.mulf %102, %116 : vector<6x5xf32>
    %126 = arith.addf %124, %125 : vector<6x5xf32>
    %127 = vector.extract_strided_slice %8 {offsets = [2, 2, 0, 0], sizes = [1, 1, 6, 5], strides = [1, 1, 1, 1]} : vector<4x3x6x5xf32> to vector<1x1x6x5xf32>
    %128 = vector.shape_cast %127 : vector<1x1x6x5xf32> to vector<6x5xf32>
    %129 = vector.extract_strided_slice %9 {offsets = [2, 2, 0, 0], sizes = [1, 1, 6, 5], strides = [1, 1, 1, 1]} : vector<4x3x6x5xf32> to vector<1x1x6x5xf32>
    %130 = vector.shape_cast %129 : vector<1x1x6x5xf32> to vector<6x5xf32>
    %131 = arith.mulf %101, %128 : vector<6x5xf32>
    %132 = arith.addf %93, %131 : vector<6x5xf32>
    %133 = arith.mulf %102, %130 : vector<6x5xf32>
    %134 = arith.subf %132, %133 : vector<6x5xf32>
    %135 = arith.mulf %101, %130 : vector<6x5xf32>
    %136 = arith.addf %97, %135 : vector<6x5xf32>
    %137 = arith.mulf %102, %128 : vector<6x5xf32>
    %138 = arith.addf %136, %137 : vector<6x5xf32>
    %139 = vector.extract_strided_slice %1 {offsets = [3, 0, 0], sizes = [1, 16, 16], strides = [1, 1, 1]} : vector<4x16x16xf32> to vector<1x16x16xf32>
    %140 = vector.shape_cast %139 : vector<1x16x16xf32> to vector<16x16xf32>
    %cst_37 = arith.constant dense<0.000000e+00> : vector<6x16xf32>
    %141 = tpu.matmul %2, %140, %cst_37 {dimension_numbers = #tpu.dot_dimension_numbers<[1], [0], [0], [1], [0, 0, 1, 1], [], []>} : vector<6x16xf32>, vector<16x16xf32>, vector<6x16xf32> -> vector<6x16xf32>
    %cst_38 = arith.constant dense<0.000000e+00> : vector<6x5xf32>
    %142 = tpu.matmul %141, %3, %cst_38 {dimension_numbers = #tpu.dot_dimension_numbers<[1], [0], [0], [1], [0, 0, 1, 1], [], []>} : vector<6x16xf32>, vector<16x5xf32>, vector<6x5xf32> -> vector<6x5xf32>
    %cst_39 = arith.constant dense<0.000000e+00> : vector<6x5xf32>
    %143 = tpu.matmul %141, %4, %cst_39 {dimension_numbers = #tpu.dot_dimension_numbers<[1], [0], [0], [1], [0, 0, 1, 1], [], []>} : vector<6x16xf32>, vector<16x5xf32>, vector<6x5xf32> -> vector<6x5xf32>
    %144 = vector.extract_strided_slice %8 {offsets = [3, 0, 0, 0], sizes = [1, 1, 6, 5], strides = [1, 1, 1, 1]} : vector<4x3x6x5xf32> to vector<1x1x6x5xf32>
    %145 = vector.shape_cast %144 : vector<1x1x6x5xf32> to vector<6x5xf32>
    %146 = vector.extract_strided_slice %9 {offsets = [3, 0, 0, 0], sizes = [1, 1, 6, 5], strides = [1, 1, 1, 1]} : vector<4x3x6x5xf32> to vector<1x1x6x5xf32>
    %147 = vector.shape_cast %146 : vector<1x1x6x5xf32> to vector<6x5xf32>
    %148 = arith.mulf %142, %145 : vector<6x5xf32>
    %149 = arith.addf %110, %148 : vector<6x5xf32>
    %150 = arith.mulf %143, %147 : vector<6x5xf32>
    %151 = arith.subf %149, %150 : vector<6x5xf32>
    %152 = arith.mulf %142, %147 : vector<6x5xf32>
    %153 = arith.addf %114, %152 : vector<6x5xf32>
    %154 = arith.mulf %143, %145 : vector<6x5xf32>
    %155 = arith.addf %153, %154 : vector<6x5xf32>
    %156 = vector.extract_strided_slice %8 {offsets = [3, 1, 0, 0], sizes = [1, 1, 6, 5], strides = [1, 1, 1, 1]} : vector<4x3x6x5xf32> to vector<1x1x6x5xf32>
    %157 = vector.shape_cast %156 : vector<1x1x6x5xf32> to vector<6x5xf32>
    %158 = vector.extract_strided_slice %9 {offsets = [3, 1, 0, 0], sizes = [1, 1, 6, 5], strides = [1, 1, 1, 1]} : vector<4x3x6x5xf32> to vector<1x1x6x5xf32>
    %159 = vector.shape_cast %158 : vector<1x1x6x5xf32> to vector<6x5xf32>
    %160 = arith.mulf %142, %157 : vector<6x5xf32>
    %161 = arith.addf %122, %160 : vector<6x5xf32>
    %162 = arith.mulf %143, %159 : vector<6x5xf32>
    %163 = arith.subf %161, %162 : vector<6x5xf32>
    %164 = arith.mulf %142, %159 : vector<6x5xf32>
    %165 = arith.addf %126, %164 : vector<6x5xf32>
    %166 = arith.mulf %143, %157 : vector<6x5xf32>
    %167 = arith.addf %165, %166 : vector<6x5xf32>
    %168 = vector.extract_strided_slice %8 {offsets = [3, 2, 0, 0], sizes = [1, 1, 6, 5], strides = [1, 1, 1, 1]} : vector<4x3x6x5xf32> to vector<1x1x6x5xf32>
    %169 = vector.shape_cast %168 : vector<1x1x6x5xf32> to vector<6x5xf32>
    %170 = vector.extract_strided_slice %9 {offsets = [3, 2, 0, 0], sizes = [1, 1, 6, 5], strides = [1, 1, 1, 1]} : vector<4x3x6x5xf32> to vector<1x1x6x5xf32>
    %171 = vector.shape_cast %170 : vector<1x1x6x5xf32> to vector<6x5xf32>
    %172 = arith.mulf %142, %169 : vector<6x5xf32>
    %173 = arith.addf %134, %172 : vector<6x5xf32>
    %174 = arith.mulf %143, %171 : vector<6x5xf32>
    %175 = arith.subf %173, %174 : vector<6x5xf32>
    %176 = arith.mulf %142, %171 : vector<6x5xf32>
    %177 = arith.addf %138, %176 : vector<6x5xf32>
    %178 = arith.mulf %143, %169 : vector<6x5xf32>
    %179 = arith.addf %177, %178 : vector<6x5xf32>
    %cst_40 = arith.constant dense<0.000000e+00> : vector<6x16xf32>
    %180 = tpu.matmul %151, %5, %cst_40 {dimension_numbers = #tpu.dot_dimension_numbers<[1], [0], [0], [1], [0, 0, 1, 1], [], []>} : vector<6x5xf32>, vector<5x16xf32>, vector<6x16xf32> -> vector<6x16xf32>
    %cst_41 = arith.constant dense<0.000000e+00> : vector<6x16xf32>
    %181 = tpu.matmul %155, %6, %cst_41 {dimension_numbers = #tpu.dot_dimension_numbers<[1], [0], [0], [1], [0, 0, 1, 1], [], []>} : vector<6x5xf32>, vector<5x16xf32>, vector<6x16xf32> -> vector<6x16xf32>
    %182 = arith.addf %180, %181 : vector<6x16xf32>
    %cst_42 = arith.constant dense<0.000000e+00> : vector<16x16xf32>
    %183 = tpu.matmul %7, %182, %cst_42 {dimension_numbers = #tpu.dot_dimension_numbers<[1], [0], [0], [1], [0, 0, 1, 1], [], []>} : vector<16x6xf32>, vector<6x16xf32>, vector<16x16xf32> -> vector<16x16xf32>
    %c0_43 = arith.constant 0 : index
    %c0_44 = arith.constant 0 : index
    %c0_45 = arith.constant 0 : index
    %c0_46 = arith.constant 0 : index
    %184 = vector.load %arg10[%c0_43, %c0_44, %c0_45, %c0_46] : memref<1x3x16x16xf32, #tpu.memory_space<vmem>>, vector<1x1x16x16xf32>
    %185 = vector.shape_cast %184 : vector<1x1x16x16xf32> to vector<16x16xf32>
    %186 = vector.shape_cast %183 : vector<16x16xf32> to vector<1x1x16x16xf32>
    tpu.vector_store %arg10[%c0_43, %c0_44, %c0_45, %c0_46], %186 {strides = array<i32>} : memref<1x3x16x16xf32, #tpu.memory_space<vmem>>, vector<1x1x16x16xf32>,
    %cst_47 = arith.constant dense<0.000000e+00> : vector<6x16xf32>
    %187 = tpu.matmul %163, %5, %cst_47 {dimension_numbers = #tpu.dot_dimension_numbers<[1], [0], [0], [1], [0, 0, 1, 1], [], []>} : vector<6x5xf32>, vector<5x16xf32>, vector<6x16xf32> -> vector<6x16xf32>
    %cst_48 = arith.constant dense<0.000000e+00> : vector<6x16xf32>
    %188 = tpu.matmul %167, %6, %cst_48 {dimension_numbers = #tpu.dot_dimension_numbers<[1], [0], [0], [1], [0, 0, 1, 1], [], []>} : vector<6x5xf32>, vector<5x16xf32>, vector<6x16xf32> -> vector<6x16xf32>
    %189 = arith.addf %187, %188 : vector<6x16xf32>
    %cst_49 = arith.constant dense<0.000000e+00> : vector<16x16xf32>
    %190 = tpu.matmul %7, %189, %cst_49 {dimension_numbers = #tpu.dot_dimension_numbers<[1], [0], [0], [1], [0, 0, 1, 1], [], []>} : vector<16x6xf32>, vector<6x16xf32>, vector<16x16xf32> -> vector<16x16xf32>
    %c0_50 = arith.constant 0 : index
    %c1 = arith.constant 1 : index
    %c0_51 = arith.constant 0 : index
    %c0_52 = arith.constant 0 : index
    %191 = vector.load %arg10[%c0_50, %c1, %c0_51, %c0_52] : memref<1x3x16x16xf32, #tpu.memory_space<vmem>>, vector<1x1x16x16xf32>
    %192 = vector.shape_cast %191 : vector<1x1x16x16xf32> to vector<16x16xf32>
    %193 = vector.shape_cast %190 : vector<16x16xf32> to vector<1x1x16x16xf32>
    tpu.vector_store %arg10[%c0_50, %c1, %c0_51, %c0_52], %193 {strides = array<i32>} : memref<1x3x16x16xf32, #tpu.memory_space<vmem>>, vector<1x1x16x16xf32>,
    %cst_53 = arith.constant dense<0.000000e+00> : vector<6x16xf32>
    %194 = tpu.matmul %175, %5, %cst_53 {dimension_numbers = #tpu.dot_dimension_numbers<[1], [0], [0], [1], [0, 0, 1, 1], [], []>} : vector<6x5xf32>, vector<5x16xf32>, vector<6x16xf32> -> vector<6x16xf32>
    %cst_54 = arith.constant dense<0.000000e+00> : vector<6x16xf32>
    %195 = tpu.matmul %179, %6, %cst_54 {dimension_numbers = #tpu.dot_dimension_numbers<[1], [0], [0], [1], [0, 0, 1, 1], [], []>} : vector<6x5xf32>, vector<5x16xf32>, vector<6x16xf32> -> vector<6x16xf32>
    %196 = arith.addf %194, %195 : vector<6x16xf32>
    %cst_55 = arith.constant dense<0.000000e+00> : vector<16x16xf32>
    %197 = tpu.matmul %7, %196, %cst_55 {dimension_numbers = #tpu.dot_dimension_numbers<[1], [0], [0], [1], [0, 0, 1, 1], [], []>} : vector<16x6xf32>, vector<6x16xf32>, vector<16x16xf32> -> vector<16x16xf32>
    %c0_56 = arith.constant 0 : index
    %c2 = arith.constant 2 : index
    %c0_57 = arith.constant 0 : index
    %c0_58 = arith.constant 0 : index
    %198 = vector.load %arg10[%c0_56, %c2, %c0_57, %c0_58] : memref<1x3x16x16xf32, #tpu.memory_space<vmem>>, vector<1x1x16x16xf32>
    %199 = vector.shape_cast %198 : vector<1x1x16x16xf32> to vector<16x16xf32>
    %200 = vector.shape_cast %197 : vector<16x16xf32> to vector<1x1x16x16xf32>
    tpu.vector_store %arg10[%c0_56, %c2, %c0_57, %c0_58], %200 {strides = array<i32>} : memref<1x3x16x16xf32, #tpu.memory_space<vmem>>, vector<1x1x16x16xf32>,
    return
  }
  func.func @transform_0(%arg0: i32) -> (i32, i32, i32, i32) {
    %c0_i32 = arith.constant 0 : i32
    %c0_i32_0 = arith.constant 0 : i32
    %c0_i32_1 = arith.constant 0 : i32
    %c0_i32_2 = arith.constant 0 : i32
    return %arg0, %c0_i32, %c0_i32_0, %c0_i32_1 : i32, i32, i32, i32
  }
  func.func @transform_1(%arg0: i32) -> (i32, i32) {
    %c0_i32 = arith.constant 0 : i32
    %c0_i32_0 = arith.constant 0 : i32
    %c0_i32_1 = arith.constant 0 : i32
    return %c0_i32, %c0_i32_0 : i32, i32
  }
  func.func @transform_2(%arg0: i32) -> (i32, i32) {
    %c0_i32 = arith.constant 0 : i32
    %c0_i32_0 = arith.constant 0 : i32
    %c0_i32_1 = arith.constant 0 : i32
    return %c0_i32, %c0_i32_0 : i32, i32
  }
  func.func @transform_3(%arg0: i32) -> (i32, i32) {
    %c0_i32 = arith.constant 0 : i32
    %c0_i32_0 = arith.constant 0 : i32
    %c0_i32_1 = arith.constant 0 : i32
    return %c0_i32, %c0_i32_0 : i32, i32
  }
  func.func @transform_4(%arg0: i32) -> (i32, i32, i32, i32) {
    %c0_i32 = arith.constant 0 : i32
    %c0_i32_0 = arith.constant 0 : i32
    %c0_i32_1 = arith.constant 0 : i32
    %c0_i32_2 = arith.constant 0 : i32
    %c0_i32_3 = arith.constant 0 : i32
    return %c0_i32, %c0_i32_0, %c0_i32_1, %c0_i32_2 : i32, i32, i32, i32
  }
  func.func @transform_5(%arg0: i32) -> (i32, i32, i32, i32) {
    %c0_i32 = arith.constant 0 : i32
    %c0_i32_0 = arith.constant 0 : i32
    %c0_i32_1 = arith.constant 0 : i32
    %c0_i32_2 = arith.constant 0 : i32
    %c0_i32_3 = arith.constant 0 : i32
    return %c0_i32, %c0_i32_0, %c0_i32_1, %c0_i32_2 : i32, i32, i32, i32
  }
  func.func @transform_6(%arg0: i32) -> (i32, i32) {
    %c0_i32 = arith.constant 0 : i32
    %c0_i32_0 = arith.constant 0 : i32
    %c0_i32_1 = arith.constant 0 : i32
    return %c0_i32, %c0_i32_0 : i32, i32
  }
  func.func @transform_7(%arg0: i32) -> (i32, i32) {
    %c0_i32 = arith.constant 0 : i32
    %c0_i32_0 = arith.constant 0 : i32
    %c0_i32_1 = arith.constant 0 : i32
    return %c0_i32, %c0_i32_0 : i32, i32
  }
  func.func @transform_8(%arg0: i32) -> (i32, i32) {
    %c0_i32 = arith.constant 0 : i32
    %c0_i32_0 = arith.constant 0 : i32
    %c0_i32_1 = arith.constant 0 : i32
    return %c0_i32, %c0_i32_0 : i32, i32
  }
  func.func @transform_9(%arg0: i32) -> (i32, i32, i32, i32) {
    %c0_i32 = arith.constant 0 : i32
    %c0_i32_0 = arith.constant 0 : i32
    %c0_i32_1 = arith.constant 0 : i32
    %c0_i32_2 = arith.constant 0 : i32
    return %arg0, %c0_i32, %c0_i32_0, %c0_i32_1 : i32, i32, i32, i32
  }
}

</mosaic_0001>

<bundles_post_ra>
// kernel: tpu_custom_call.1
= control target key start
LH: loop header
LB: loop body
LE: loop exit
PB: predicated region body
PF: predicated region fallthrough
CT: control target
= control target key end

     0   :  { %14 = vsyncpa [#allocation3], 0  ;;  %s1496_s0 = inlined_call_operand.vmem [shape: f32[2,4,16,16], index: 0, kind: input, shape index: {}]   ;;  %s1497_s1 = inlined_call_operand.vmem [shape: f32[6,16], index: 1, kind: input, shape index: {}]   ;;  %s1498_s2 = inlined_call_operand.vmem [shape: f32[16,5], index: 2, kind: input, shape index: {}]   ;;  %s1499_s3 = inlined_call_operand.vmem [shape: f32[16,5], index: 3, kind: input, shape index: {}]   ;;  %s1500_s4 = inlined_call_operand.vmem [shape: f32[4,3,6,5], index: 4, kind: input, shape index: {}]   ;;  %s1501_s5 = inlined_call_operand.vmem [shape: f32[4,3,6,5], index: 5, kind: input, shape index: {}]   ;;  %s1502_s6 = inlined_call_operand.vmem [shape: f32[5,16], index: 6, kind: input, shape index: {}]   ;;  %s1503_s7 = inlined_call_operand.vmem [shape: f32[5,16], index: 7, kind: input, shape index: {}]   ;;  %s1504_s8 = inlined_call_operand.vmem [shape: f32[16,6], index: 8, kind: input, shape index: {}]   ;;  %s1505_s9 = inlined_call_operand.hbm [shape: f32[2,3,16,16], index: 9, kind: output, shape index: {}]  }
   0x1   :  { %16 = vsyncpa [#allocation3 + $0x1], 0  ;;  %s1248_s30 = smov 0   ;;  %s1250_s10 = smov 0  }
   0x2   :  { %s1252_s11 = smov 0   ;;  %s1254_s12 = smov 0  }
   0x3 LB: > { %s1269_s13 = sadd.s32 4294967295, %s1194_s12   ;;  %s1042_s14 = sadd.s32 4294967294, %s1194_s12   ;;  %s1194_s12 = sphi %s1254_s12, %s1511_s12   ;;  %s1190_s11 = sphi %s1252_s11, %s1510_s11   ;;  %s1186_s10 = sphi %s1250_s10, %s1509_s10   ;;  %s1182_s30 = sphi %s1248_s30, %s1508_s30  }
   0x4   : > { %s1273_s15 = sadd.s32 1, %s1194_s12   ;;  %s223_s16 = sadd.s32 1, %s1190_s11 }
   0x5   : > { %s220_s17 = ssub.s32 %s1194_s12, %s1273_s15  ;;  %p233_p0 = scmp.ne.s32.totalorder %s1190_s11, %s1186_s10 }
   0x6   : > { %p221_p1 = scmp.eq.s32.totalorder %s220_s17, 0  ;;  %p234_p2 = scmp.eq.s32.totalorder %s1269_s13, 1 }
   0x7   : > { %p239_p3 = scmp.ne.s32.totalorder %s1186_s10, %s1182_s30  ;;  %p240_p4 = scmp.eq.s32.totalorder %s1042_s14, 1 }
   0x8   : > { %s1284_s18 = scalar_select %p221_p1, %s1190_s11, %s223_s16  }
   0x9   : > { %p1286_p5 = por %p234_p2, %p233_p0  ;;  %p1290_p6 = por %p240_p4, %p239_p3 }
   0xa   : > { %p1045_p7 = scmp.ge.s32.totalorder %s1194_s12, 1  ;;  %p290_p8 = scmp.lt.s32.totalorder %s1194_s12, 3 }
   0xc   : > { %p291_p9 = pnand %p1045_p7, %p290_p8 }
   0xd   : > { %p326_p10 = scmp.lt.s32.totalorder (!%p291_p9), %s1269_s13, 1  ;;  %s323_s17 = sand.u32 (!%p291_p9), 1, %s1186_s10  }
   0xe   : > { %294 = sbr.rel (%p291_p9) target bundleno = 854 (0x356), region = 56  ;;  %s1152_s24 = scalar_lea.hbm (!%p291_p9), %s1505_s9, 96 }
   0xf   : > { %s1089_s21 = smul.u32 (!%p291_p9), 48, %s323_s17 }
  0x10   : > { %s1090_s23 = smul.u32 (!%p291_p9), 48, %s1269_s13 }
  0x11   : > { %s325_s22 = scalar_lea.vmem (!%p291_p9), [#allocation2], %s1089_s21 }
  0x12   : > { %s977_s27 = sshll.u32 (!%p291_p9), %s325_s22, 4  ;;  %s978_s27 = int_to_ptr.vmem [resolvable:$true] %s977_s27 }
  0x13   : > { %v341_v0 = vld [vmem:[%s1498_s2 + $0x8] sm:$0xff]  ;;  %s327_s25 = scalar_select %p326_p10, %s1269_s13, 1  ;;  %v339_v4 = vld [vmem:[%s1497_s1] sm:$0x3f]  ;;  %vm372_vm0 = vcmask 130048   ;;  %vm728_vm1 = vcmask 1044480  }
  0x14   : > { %v343_v1 = vld [vmem:[%s1499_s3 + $0x8] sm:$0xff]  ;;  %413 = vmatpush.msra.mxu1 %v341_v0  ;;  %v340_v5 = vld [vmem:[%s1498_s2] sm:$0xff]  ;;  %v350_v21 = vld [vmem:[%s1500_s4 + $0x10] sm:$0x3f]  ;;  %vm724_vm2 = vcmask 39936   ;;  %vm785_vm3 = vcmask 1045504  }
  0x15   : > { %433 = vmatpush.msra.mxu3 %v343_v1  ;;  %s1088_s26 = sshll.u32 %s327_s25, 6  ;;  %v342_v6 = vld [vmem:[%s1499_s3] sm:$0xff]  ;;  %v349_v19 = vld [vmem:[%s1500_s4 + $0x8] sm:$0x3f]  ;;  %v362_v23 = vld [vmem:[%s1501_s5 + $0x10] sm:$0x3f] }
  0x16   : > { %s1307_s29 = scalar_lea.vmem %s1496_s0, %s1088_s26  ;;  %414 = vmatpush.msra.mxu1 %v340_v5  ;;  %v348_v18 = vld [vmem:[%s1500_s4] sm:$0x3f]  ;;  %v361_v22 = vld [vmem:[%s1501_s5 + $0x8] sm:$0x3f]  ;;  %v351_v32 = vld [vmem:[%s1500_s4 + $0x18] sm:$0x3f]  ;;  %s976_s26 = scalar_lea.hbm %s1505_s9, %s1090_s23 }
  0x17   : > { %v332_v2 = vld [vmem:[%s1307_s29 + $0x8] sm:$0xff]  ;;  %v331_v3 = vld [vmem:[%s1307_s29] sm:$0xff]  ;;  %434 = vmatpush.msra.mxu3 %v342_v6  ;;  %v334_v8 = vld [vmem:[%s1307_s29 + $0x18] sm:$0xff]  ;;  %vm778_vm4 = vcmask 48128   ;;  %s979_s28 = sshll.u32 %s976_s26, 4  ;;  %s980_s28 = int_to_ptr.hbm [resolvable:$true] %s979_s28 }
  0x18   : > { %390 = vmatpush.msra.mxu0 %v332_v2  ;;  %v336_v7 = vld [vmem:[%s1307_s29 + $0x28] sm:$0xff]  ;;  %v335_v9 = vld [vmem:[%s1307_s29 + $0x20] sm:$0xff]  ;;  %520 = vmatpush.msrb.mxu1 %v343_v1  ;;  %v333_v10 = vld [vmem:[%s1307_s29 + $0x10] sm:$0xff]  ;;  %s1146_s14 = sshra.s32 %s980_s28, 4  ;;  %s1147_s14 = int_to_ptr.hbm [resolvable:$true] %s1146_s14 }
  0x19   : > { %564 = vmatpush.msra.mxu2 %v336_v7  ;;  %477 = vmatpush.msrb.mxu3 %v334_v8  ;;  %v338_v13 = vld [vmem:[%s1307_s29 + $0x38] sm:$0xff]  ;;  %v337_v14 = vld [vmem:[%s1307_s29 + $0x30] sm:$0xff]  ;;  %v360_v20 = vld [vmem:[%s1501_s5] sm:$0x3f]  ;;  %s965_s29 = scalar_lea.sflag [#allocation3], %s323_s17  ;;  %s1148_s16 = scalar_lea.hbm %s1147_s14, 48 }
  0x1a   : > { %391 = vmatpush.msra.mxu0 %v331_v3  ;;  %521 = vmatpush.msrb.mxu1 %v342_v6  ;;  %v352_v37 = vld [vmem:[%s1500_s4 + $0x20] sm:$0x3f]  ;;  %v363_v38 = vld [vmem:[%s1501_s5 + $0x18] sm:$0x3f]  ;;  %v353_v42 = vld [vmem:[%s1500_s4 + $0x28] sm:$0x3f]  ;;  %p1149_p11 = scmp.ne.s32.totalorder %s1147_s14, %s1148_s16  ;;  %p1153_p0 = scmp.lt.s32.totalorder %s1147_s14, %s1505_s9 }
  0x1b   : > { %1048 = vmatmul.msk.f32.vlgmr.msra.gmra.mxu0 %vm372_vm0, %v339_v4  ;;  %565 = vmatpush.msra.mxu2 %v335_v9  ;;  %v364_v39 = vld [vmem:[%s1501_s5 + $0x20] sm:$0x3f]  ;;  %v365_v43 = vld [vmem:[%s1501_s5 + $0x28] sm:$0x3f]  ;;  %p1154_p1 = scmp.lt.s32.totalorder %s1152_s24, %s1148_s16 }
  0x1c   : > { %500 = vmatpush.msrb.mxu0 %v341_v0  ;;  %478 = vmatpush.msrb.mxu3 %v333_v10  ;;  %p1150_p12 = pnand %p1149_p11, %p1286_p5 }
  0x1d   : > { %1054 = vmatmul.msk.f32.vlgmr.msra.gmra.mxu2 %vm372_vm0, %v339_v4  ;;  %p1155_p2 = por %p1154_p1, %p1153_p0 }
  0x1e   : > { %501 = vmatpush.msrb.mxu0 %v340_v5  ;;  %674 = vmatpush.msrb.mxu2 %v341_v0  ;;  %p1151_p13 = pneg %p1150_p12 }
  0x20   : > { %607 = vmatpush.msra.mxu0 %v343_v1  ;;  %675 = vmatpush.msrb.mxu2 %v340_v5  ;;  %p1156_p3 = pnand %p1155_p2, %p1151_p13 }
  0x22   : > { %608 = vmatpush.msra.mxu0 %v342_v6 }
  0x98   : > { %v393_v11 = vpop.f32.mrf.mxu0 }
  0x99   : > { %1049 = vmatmul.msk.f32.vlgmr.msra.gmra.mxu1 %vm372_vm0, %v393_v11  ;;  %1050 = vmatmul.msk.f32.vlgmr.msra.gmra.mxu3 %vm372_vm0, %v393_v11  ;;  %v345_v11 = vld [vmem:[%s1503_s7] sm:$0x1f] }
  0x9a   : > { %587 = vmatpush.msra.mxu3 %v341_v0  ;;  %651 = vmatpush.msra.mxu1 %v338_v13  ;;  %v354_v13 = vld [vmem:[%s1500_s4 + $0x30] sm:$0x3f] }
  0x9c   : > { %588 = vmatpush.msra.mxu3 %v340_v5  ;;  %652 = vmatpush.msra.mxu1 %v337_v14  ;;  %v366_v14 = vld [vmem:[%s1501_s5 + $0x30] sm:$0x3f] }
  0xa0   : > { %v567_v12 = vpop.f32.mrf.mxu2 }
  0xa1   : > { %1051 = vmatmul.msk.f32.vlgmr.msrb.gmra.mxu3 %vm372_vm0, %v339_v4 }
  0xa2   : > { %694 = vmatpush.msrb.mxu3 %v343_v1 }
  0xa4   : > { %695 = vmatpush.msrb.mxu3 %v342_v6 }
  0xa9   : > { %1055 = vmatmul.msk.f32.vlgmr.msra.gmra.mxu3 %vm372_vm0, %v567_v12 }
  0xaa   : > { %1067 = vmatpush.msk.msra.mxu3 %vm728_vm1, %v345_v11 }
 0x116   : > { %v416_v17 = vpop.f32.mrf.mxu1 }
 0x117   : > { %v439_v30 = vmul.f32 %v416_v17, %v348_v18  ;;  %v443_v31 = vmul.f32 %v416_v17, %v360_v20  ;;  %v447_v33 = vmul.f32 %v416_v17, %v349_v19  ;;  %v451_v34 = vmul.f32 %v416_v17, %v361_v22 }
 0x118   : > { %v455_v35 = vmul.f32 %v416_v17, %v350_v21  ;;  %v459_v36 = vmul.f32 %v416_v17, %v362_v23 }
 0x11c   : > { %v436_v15 = vpop.f32.mrf.mxu3 }
 0x11d   : > { %v441_v24 = vmul.f32 %v436_v15, %v360_v20  ;;  %v445_v25 = vmul.f32 %v436_v15, %v348_v18  ;;  %v449_v26 = vmul.f32 %v436_v15, %v361_v22  ;;  %v453_v27 = vmul.f32 %v436_v15, %v349_v19 }
 0x11e   : > { %v457_v28 = vmul.f32 %v436_v15, %v362_v23  ;;  %v461_v29 = vmul.f32 %v436_v15, %v350_v21  ;;  %v355_v21 = vld [vmem:[%s1500_s4 + $0x38] sm:$0x3f] }
 0x11f   : > { %v442_v40 = vsub.f32 %v439_v30, %v441_v24  ;;  %v446_v41 = vadd.f32 %v445_v25, %v443_v31  ;;  %v450_v44 = vsub.f32 %v447_v33, %v449_v26  ;;  %v454_v45 = vadd.f32 %v453_v27, %v451_v34  ;;  %v357_v27 = vld [vmem:[%s1500_s4 + $0x48] sm:$0x3f]  ;;  %v368_v30 = vld [vmem:[%s1501_s5 + $0x40] sm:$0x3f] }
 0x120   : > { %v458_v46 = vsub.f32 %v455_v35, %v457_v28  ;;  %v462_v47 = vadd.f32 %v461_v29, %v459_v36  ;;  %v369_v28 = vld [vmem:[%s1501_s5 + $0x48] sm:$0x3f]  ;;  %v370_v29 = vld [vmem:[%s1501_s5 + $0x50] sm:$0x3f] }
 0x124   : > { %v480_v16 = vpop.f32.mrf.mxu3 }
 0x125   : > { %1052 = vmatmul.msk.f32.vlgmr.msrb.gmra.mxu0 %vm372_vm0, %v480_v16  ;;  %1053 = vmatmul.msk.f32.vlgmr.msrb.gmra.mxu1 %vm372_vm0, %v480_v16  ;;  %v367_v16 = vld [vmem:[%s1501_s5 + $0x38] sm:$0x3f] }
 0x126   : > { %1060 = vmatpush.msk.msrb.mxu0 %vm728_vm1, %v345_v11 }
 0x12c   : > { %v590_v15 = vpop.f32.mrf.mxu3 }
 0x12d   : > { %1056 = vmatmul.msk.f32.vlgmr.msra.gmra.mxu0 %vm372_vm0, %v567_v12  ;;  %1057 = vmatmul.msk.f32.vlgmr.msra.gmra.mxu1 %vm372_vm0, %v339_v4  ;;  %v344_v12 = vld [vmem:[%s1502_s6] sm:$0x1f]  ;;  %v613_v18 = vmul.f32 %v590_v15, %v354_v13  ;;  %v617_v19 = vmul.f32 %v590_v15, %v366_v14  ;;  %v625_v20 = vmul.f32 %v590_v15, %v367_v16 }
 0x12e   : > { %1062 = vmatpush.msk.msrb.mxu1 %vm728_vm1, %v344_v12  ;;  %1069 = vmatpush.msk.msra.mxu0 %vm728_vm1, %v344_v12 }
 0x1a2   : > { %v503_v48 = vpop.f32.mrf.mxu0  ;;  %v523_v49 = vpop.f32.mrf.mxu1 }
 0x1a3   : > { %v526_v50 = vmul.f32 %v503_v48, %v351_v32  ;;  %v530_v51 = vmul.f32 %v503_v48, %v363_v38  ;;  %v534_v52 = vmul.f32 %v503_v48, %v352_v37  ;;  %v538_v53 = vmul.f32 %v503_v48, %v364_v39 }
 0x1a4   : > { %v542_v54 = vmul.f32 %v503_v48, %v353_v42  ;;  %v546_v55 = vmul.f32 %v503_v48, %v365_v43  ;;  %v528_v56 = vmul.f32 %v523_v49, %v363_v38  ;;  %v532_v57 = vmul.f32 %v523_v49, %v351_v32 }
 0x1a5   : > { %v527_v58 = vadd.f32 %v526_v50, %v442_v40  ;;  %v531_v59 = vadd.f32 %v530_v51, %v446_v41  ;;  %v1372_v60 = vadd.f32 %v534_v52, %v450_v44  ;;  %v539_v61 = vadd.f32 %v538_v53, %v454_v45  ;;  %v356_v45 = vld [vmem:[%s1500_s4 + $0x40] sm:$0x3f] }
 0x1a6   : > { %v1374_v62 = vadd.f32 %v542_v54, %v458_v46  ;;  %v547_v63 = vadd.f32 %v546_v55, %v462_v47  ;;  %v1376_v0 = vmul.f32 %v523_v49, %v364_v39  ;;  %v540_v1 = vmul.f32 %v523_v49, %v352_v37  ;;  %v358_v37 = vld [vmem:[%s1500_s4 + $0x50] sm:$0x3f]  ;;  %v371_v46 = vld [vmem:[%s1501_s5 + $0x58] sm:$0x3f] }
 0x1a7   : > { %v529_v2 = vsub.f32 %v527_v58, %v528_v56  ;;  %v533_v3 = vadd.f32 %v532_v57, %v531_v59  ;;  %v1378_v4 = vmul.f32 %v523_v49, %v365_v43  ;;  %v548_v5 = vmul.f32 %v523_v49, %v353_v42 }
 0x1a8   : > { %v537_v6 = vsub.f32 %v1372_v60, %v1376_v0  ;;  %v541_v7 = vadd.f32 %v540_v1, %v539_v61  ;;  %v621_v32 = vmul.f32 %v590_v15, %v355_v21  ;;  %v633_v42 = vmul.f32 %v590_v15, %v368_v30  ;;  %v359_v0 = vld [vmem:[%s1500_s4 + $0x58] sm:$0x3f] }
 0x1a9   : > { %v545_v8 = vsub.f32 %v1374_v62, %v1378_v4  ;;  %v549_v9 = vadd.f32 %v548_v5, %v547_v63  ;;  %v614_v25 = vadd.f32 %v613_v18, %v529_v2  ;;  %v618_v26 = vadd.f32 %v617_v19, %v533_v3  ;;  %v346_v62 = vld [vmem:[%s1504_s8] sm:$0xff] }
 0x1aa   : > { %v654_v10 = vpop.f32.mrf.mxu1  ;;  %v610_v17 = vpop.f32.mrf.mxu0  ;;  %v626_v31 = vadd.f32 %v625_v20, %v541_v7  ;;  %v622_v53 = vadd.f32 %v621_v32, %v537_v6  ;;  %v629_v63 = vmul.f32 %v590_v15, %v356_v45  ;;  %v347_v20 = vld [vmem:[%s1504_s8 + $0x8] sm:$0xff] }
 0x1ab   : > { %1058 = vmatmul.msk.f32.vlgmr.msrb.gmra.mxu2 %vm372_vm0, %v654_v10  ;;  %1059 = vmatmul.msk.f32.vlgmr.msrb.gmra.mxu3 %vm372_vm0, %v654_v10  ;;  %v615_v22 = vmul.f32 %v610_v17, %v366_v14  ;;  %v619_v23 = vmul.f32 %v610_v17, %v354_v13  ;;  %v627_v24 = vmul.f32 %v610_v17, %v355_v21 }
 0x1ac   : > { %1076 = vmatpush.msk.msrb.mxu3 %vm728_vm1, %v345_v11  ;;  %v623_v43 = vmul.f32 %v610_v17, %v367_v16  ;;  %v635_v51 = vmul.f32 %v610_v17, %v356_v45  ;;  %v634_v57 = vadd.f32 %v633_v42, %v549_v9  ;;  %v631_v3 = vmul.f32 %v610_v17, %v368_v30 }
 0x1ad   : > { %v616_v33 = vsub.f32 %v614_v25, %v615_v22  ;;  %v620_v34 = vadd.f32 %v619_v23, %v618_v26  ;;  %v628_v36 = vadd.f32 %v627_v24, %v626_v31  ;;  %v630_v7 = vadd.f32 %v629_v63, %v545_v8 }
 0x1ae   : > { %v624_v60 = vsub.f32 %v622_v53, %v623_v43  ;;  %v636_v61 = vadd.f32 %v635_v51, %v634_v57 }
 0x1af   : > { %v632_v13 = vsub.f32 %v630_v7, %v631_v3 }
 0x22e   : > { %v677_v35 = vpop.f32.mrf.mxu2  ;;  %v697_v41 = vpop.f32.mrf.mxu3 }
 0x22f   : > { %v700_v38 = vmul.f32 %v677_v35, %v357_v27  ;;  %v704_v39 = vmul.f32 %v677_v35, %v369_v28  ;;  %v712_v40 = vmul.f32 %v677_v35, %v370_v29  ;;  %v702_v44 = vmul.f32 %v697_v41, %v369_v28 }
 0x230   : > { %v706_v50 = vmul.f32 %v697_v41, %v357_v27  ;;  %v714_v52 = vmul.f32 %v697_v41, %v358_v37  ;;  %v708_v54 = vmul.f32 %v677_v35, %v358_v37  ;;  %v720_v58 = vmul.f32 %v677_v35, %v371_v46 }
 0x231   : > { %v701_v47 = vadd.f32 %v700_v38, %v616_v33  ;;  %v705_v48 = vadd.f32 %v704_v39, %v620_v34  ;;  %v713_v49 = vadd.f32 %v712_v40, %v628_v36  ;;  %v710_v5 = vmul.f32 %v697_v41, %v370_v29 }
 0x232   : > { %v709_v1 = vadd.f32 %v708_v54, %v624_v60  ;;  %v721_v2 = vadd.f32 %v720_v58, %v636_v61  ;;  %v722_v6 = vmul.f32 %v697_v41, %v359_v0  ;;  %v716_v9 = vmul.f32 %v677_v35, %v359_v0 }
 0x233   : > { %v707_v55 = vadd.f32 %v706_v50, %v705_v48  ;;  %v703_v56 = vsub.f32 %v701_v47, %v702_v44  ;;  %v715_v59 = vadd.f32 %v714_v52, %v713_v49  ;;  %v718_v14 = vmul.f32 %v697_v41, %v371_v46 }
 0x234   : > { %v711_v10 = vsub.f32 %v709_v1, %v710_v5  ;;  %v723_v11 = vadd.f32 %v722_v6, %v721_v2 }
 0x235   : > { %1061 = vmatmul.msk.f32.vlgmr.msrb.gmra.mxu0 %vm724_vm2, %v707_v55  ;;  %1063 = vmatmul.msk.f32.vlgmr.msrb.gmra.mxu1 %vm724_vm2, %v703_v56 }
 0x236   : > { %1068 = vmatmul.msk.f32.vlgmr.msra.gmra.mxu3 %vm724_vm2, %v715_v59  ;;  %1078 = vmatpush.msk.msrb.mxu0 %vm728_vm1, %v344_v12  ;;  %v717_v12 = vadd.f32 %v716_v9, %v632_v13 }
 0x238   : > { %v719_v15 = vsub.f32 %v717_v12, %v718_v14 }
 0x23d   : > { %1070 = vmatmul.msk.f32.vlgmr.msra.gmra.mxu0 %vm724_vm2, %v711_v10 }
 0x23e   : > { %1077 = vmatmul.msk.f32.vlgmr.msrb.gmra.mxu3 %vm724_vm2, %v723_v11 }
 0x245   : > { %1079 = vmatmul.msk.f32.vlgmr.msrb.gmra.mxu0 %vm724_vm2, %v719_v15 }
 0x2b2   : > { %v749_v16 = vpop.f32.mrf.mxu0  ;;  %v775_v17 = vpop.f32.mrf.mxu1 }
 0x2b3   : > { %v776_v18 = vadd.f32 %v775_v17, %v749_v16 }
 0x2b5   : > { %1064 = vmatpush.msk.msra.mxu2 %vm785_vm3, %v776_v18 }
 0x2b6   : > { %1065 = vmatmul.msk.f32.vlgmr.msra.gmra.mxu2 %vm778_vm4, %v346_v62 }
 0x2b9   : > { %v834_v4 = vpop.f32.mrf.mxu3 }
 0x2ba   : > { %v857_v8 = vpop.f32.mrf.mxu0 }
 0x2bb   : > { %v858_v19 = vadd.f32 %v857_v8, %v834_v4 }
 0x2bd   : > { %1071 = vmatpush.msk.msra.mxu1 %vm785_vm3, %v858_v19 }
 0x2be   : > { %1066 = vmatmul.msk.f32.gmra.mxu2 %vm778_vm4, %v347_v20  ;;  %1072 = vmatmul.msk.f32.vlgmr.msra.gmra.mxu1 %vm778_vm4, %v346_v62 }
 0x2c1   : > { %v909_v21 = vpop.f32.mrf.mxu3 }
 0x2c2   : > { %v932_v22 = vpop.f32.mrf.mxu0 }
 0x2c3   : > { %v933_v23 = vadd.f32 %v932_v22, %v909_v21 }
 0x2c5   : > { %1080 = vmatpush.msk.msrb.mxu2 %vm785_vm3, %v933_v23 }
 0x2c6   : > { %1081 = vmatmul.msk.f32.vlgmr.msrb.gmra.mxu2 %vm778_vm4, %v346_v62  ;;  %1073 = vmatmul.msk.f32.gmra.mxu1 %vm778_vm4, %v347_v20 }
 0x2ce   : > { %1082 = vmatmul.msk.f32.gmra.mxu2 %vm778_vm4, %v347_v20 }
 0x339   : > { %v806_v24 = vpop.f32.mrf.mxu2 }
 0x33a   : > { %812 = vst.msk [vmem:[%s325_s22] sm:$0xff] %vm372_vm0, %v806_v24 }
 0x33b   : > { %v880_v25 = vpop.f32.mrf.mxu1 }
 0x33c   : > { %1074 = vst.msk [vmem:[%s325_s22 + $0x10] sm:$0xff] %vm372_vm0, %v880_v25 }
 0x341   : > { %v809_v26 = vpop.f32.mrf.mxu2 }
 0x342   : > { %813 = vst.msk [vmem:[%s325_s22 + $0x8] sm:$0xff] %vm372_vm0, %v809_v26 }
 0x343   : > { %v883_v27 = vpop.f32.mrf.mxu1 }
 0x344   : > { %1075 = vst.msk [vmem:[%s325_s22 + $0x18] sm:$0xff] %vm372_vm0, %v883_v27 }
 0x349   : > { %v955_v28 = vpop.f32.mrf.mxu2 }
 0x34a   : > { %1083 = vst.msk [vmem:[%s325_s22 + $0x20] sm:$0xff] %vm372_vm0, %v955_v28 }
 0x351   : > { %v958_v29 = vpop.f32.mrf.mxu2 }
 0x352   : > { %1084 = vst.msk [vmem:[%s325_s22 + $0x28] sm:$0xff] %vm372_vm0, %v958_v29 }
 0x353   : > { %1159 = shalt.err (!%p1156_p3)
}
 0x354   : > { %s1196_s17 = smov 128   ;;  %s1197_s22 = smov 8  }
 0x355   : > { %1091 = dma.vmem_to_hbm [thread:$0]  (%p1286_p5), %s978_s27, 768, %s980_s28, %s965_s29, %s1196_s17, %s1196_s17, %s1197_s22  }
 0x356 PF: > { %p1097_p4 = scmp.ge.s32.totalorder %s1194_s12, 2  ;;  %s994_s26 = sand.u32 1, %s1182_s30  }
 0x357   : > { %s995_s13 = scalar_lea.sflag [#allocation3], %s994_s26 }
 0x358   : > { %p1094_p7 = pnand %p1097_p4, %p1290_p6 }
 0x35a   : > { %p1095_p8 = pneg %p1094_p7 }
 0x35c   : > { %1177 = dma.done.wait (%p1095_p8), %s995_s13, 768  }
 0x35d   : > { %1179 = vsyncadd (%p1095_p8), %s995_s13, 4294966528  ;;  %p19_p9 = scmp.ge.s32.totalorder %s1273_s15, 4   ;;  %s1508_s30 = smov %s1186_s10 }
 0x35e   : > { %s1509_s10 = smov %s1190_s11  ;;  %s1510_s11 = smov %s1284_s18 }
 0x35f   : > { %s1511_s12 = smov %s1273_s15  ;;  %21 = sbr.rel (!%p19_p9) target bundleno = 3 (0x3), region = 93 }
 0x364   :  { %1001 = vsyncpa [#allocation3], 1 }
 0x365   :  { %1003 = vsyncpa [#allocation3 + $0x1], 1 }

</bundles_post_ra>
